<compile_context>
chip_gen: v7x
topology: tpu7x:2x2x1
jax: 0.10.0
libtpu: 0.0.40
codegen_flags: <defaults>
</compile_context>

<pallas_src>
import functools

import jax
import jax.numpy as jnp
from jax import lax
from jax.experimental import pallas as pl
from jax.experimental.pallas import tpu as pltpu


# ---------------------------------------------------------------------------
# Kernel 1: conv (one folded-tap matmul) + bias + per-tile BN partial stats.
#   patches_ref: (Kc, TM) bf16   w_ref: (Co, Kc) bf16   bias_ref: (Co, 1) f32
#   y_ref:       (Co, TM) f32    stats_ref: (Co, 2) f32  [sum, sum-of-squares]
# ---------------------------------------------------------------------------
def _conv_stats_kernel(patches_ref, w_ref, bias_ref, y_ref, stats_ref):
    acc = jnp.dot(w_ref[...], patches_ref[...],
                  preferred_element_type=jnp.float32)        # (Co, TM), lane-dense
    acc = acc + bias_ref[...]                                 # (Co, 1) broadcast
    y_ref[...] = acc
    s = jnp.sum(acc, axis=1, keepdims=True)                   # (Co, 1)
    ss = jnp.sum(acc * acc, axis=1, keepdims=True)            # (Co, 1)
    stats_ref[...] = jnp.concatenate([s, ss], axis=1)         # (Co, 2)


# ---------------------------------------------------------------------------
# Kernel 2: fused BatchNorm (pre-folded scale/shift, incl. 1/p_keep) +
#           Dropout (uint32 threshold compare) + ReLU.
# ---------------------------------------------------------------------------
def _bn_drop_relu_kernel(threshold, apply_dropout,
                         y_ref, scale_ref, shift_ref, rnd_ref, o_ref):
    y = y_ref[...] * scale_ref[...] + shift_ref[...]
    y = jnp.maximum(y, 0.0)
    if apply_dropout:
        keep = rnd_ref[...] < jnp.uint32(threshold)
        y = jnp.where(keep, y, 0.0)
    o_ref[...] = y.astype(o_ref.dtype)


def _phase_taps(K, padding, parity):
    """Taps of the equivalent stride-1 conv that are non-zero for this output parity.

    Returns a list of (d, kflip): input offset d (output-quadrant coords) and the
    (already flipped) kernel index along that spatial axis.  stride is fixed at 2.
    """
    P = K - 1 - padding
    taps = []
    for kd in range(K):                      # tap index of the dilated-input conv
        if (parity + kd - P) % 2 == 0:
            taps.append(((parity + kd - P) // 2, K - 1 - kd))
    return taps


def _choose_tile(m):
    for tm in (2048, 1024, 512, 256, 128):
        if m % tm == 0:
            return tm
    return m                                  # single full block (still legal)


def g_deconv_bn_dr_relu_concat(x, w, b, gamma, beta, seed, skip_input=None, *,
                               padding=0, p_keep_drop=0.8, eps=1e-5):
    """x: (N, Ci, Hin, Win) NCHW.  w: (Ci, Co, K, K) (PyTorch ConvTranspose2d layout)."""
    N, Ci, Hin, Win = x.shape
    _, Co, K, _ = w.shape
    stride = 2                                 # fixed by the module
    assert K % 2 == 0, "sub-pixel decomposition here assumes an even filter_size"
    Hout = (Hin - 1) * stride - 2 * padding + K
    Wout = (Win - 1) * stride - 2 * padding + K
    Hq, Wq = Hout // 2, Wout // 2
    Mq = N * Hq * Wq                           # output pixels per parity phase
    M = 4 * Mq                                 # total output pixels
    Kc = (K // 2) ** 2 * Ci                    # folded contraction depth

    # ---- sub-pixel im2col: 4 dense phases, taps folded into the contraction ----
    h_taps = [_phase_taps(K, padding, p) for p in range(2)]
    w_taps = [_phase_taps(K, padding, p) for p in range(2)]
    all_dh = [d for t in h_taps for d, _ in t]
    all_dw = [d for t in w_taps for d, _ in t]
    plo_h, phi_h = max(0, -min(all_dh)), max(0, Hq + max(all_dh) - Hin)
    plo_w, phi_w = max(0, -min(all_dw)), max(0, Wq + max(all_dw) - Win)
    x_pad = jnp.pad(x, ((0, 0), (0, 0), (plo_h, phi_h), (plo_w, phi_w)))

    patch_list, wt_list = [], []
    for ph in range(2):
        for pw in range(2):
            cols, wcols = [], []
            for dh, kfh in h_taps[ph]:
                for dw, kfw in w_taps[pw]:
                    sl = x_pad[:, :, dh + plo_h:dh + plo_h + Hq,
                               dw + plo_w:dw + plo_w + Wq]          # (N, Ci, Hq, Wq)
                    cols.append(jnp.transpose(sl, (1, 0, 2, 3)).reshape(Ci, Mq))
                    wcols.append(jnp.transpose(w[:, :, kfh, kfw]))  # (Co, Ci)
            patch_list.append(jnp.concatenate(cols, axis=0))        # (Kc, Mq)
            wt_list.append(jnp.concatenate(wcols, axis=1))          # (Co, Kc)
    patches = jnp.stack(patch_list).astype(jnp.bfloat16)            # (4, Kc, Mq)
    w_t = jnp.stack(wt_list).astype(jnp.bfloat16)                   # (4, Co, Kc)
    bias_c = b.reshape(Co, 1).astype(jnp.float32)

    TM = _choose_tile(Mq)
    nT = Mq // TM

    # ---- pass 1: conv + bias + per-tile partial statistics ----
    y_conv, stats = pl.pallas_call(
        _conv_stats_kernel,
        grid=(4, nT),
        in_specs=[
            pl.BlockSpec((None, Kc, TM), lambda p, t: (p, 0, t)),   # patches (phase, tile)
            pl.BlockSpec((None, Co, Kc), lambda p, t: (p, 0, 0)),   # weights resident/phase
            pl.BlockSpec((Co, 1), lambda p, t: (0, 0)),             # bias resident
        ],
        out_specs=[
            pl.BlockSpec((None, Co, TM), lambda p, t: (p, 0, t)),
            pl.BlockSpec((None, None, Co, 2), lambda p, t: (p, t, 0, 0)),
        ],
        out_shape=[
            jax.ShapeDtypeStruct((4, Co, Mq), jnp.float32),
            jax.ShapeDtypeStruct((4, nT, Co, 2), jnp.float32),
        ],
        compiler_params=pltpu.CompilerParams(
            dimension_semantics=("parallel", "parallel")),
    )(patches, w_t, bias_c)

    # ---- tiny stats reduce + fold BN affine and 1/p_keep into scale/shift ----
    count = float(M)
    tot = jnp.sum(stats, axis=(0, 1))                      # (Co, 2)
    mean = tot[:, 0] / count
    var = jnp.maximum(tot[:, 1] / count - mean * mean, 0.0)   # biased var (train BN)
    rstd = lax.rsqrt(var + eps)
    s0 = gamma.astype(jnp.float32) * rstd
    apply_dropout = float(p_keep_drop) < 1.0
    inv_keep = 1.0 / float(p_keep_drop) if apply_dropout else 1.0
    scale = (s0 * inv_keep).reshape(Co, 1)
    shift = ((beta.astype(jnp.float32) - mean * s0) * inv_keep).reshape(Co, 1)

    # dropout mask bits (host-side RNG; see TODO(synk) at the top)
    rnd = jax.random.bits(jax.random.PRNGKey(seed), (4, Co, Mq), dtype=jnp.uint32)
    threshold = min(int(round(float(p_keep_drop) * 2.0 ** 32)), 2 ** 32 - 1)

    # ---- pass 2: fused BN + dropout + ReLU epilogue (lane-dense blocks) ----
    kernel2 = functools.partial(_bn_drop_relu_kernel, threshold, apply_dropout)
    y_act = pl.pallas_call(
        kernel2,
        grid=(4, nT),
        in_specs=[
            pl.BlockSpec((None, Co, TM), lambda p, t: (p, 0, t)),
            pl.BlockSpec((Co, 1), lambda p, t: (0, 0)),
            pl.BlockSpec((Co, 1), lambda p, t: (0, 0)),
            pl.BlockSpec((None, Co, TM), lambda p, t: (p, 0, t)),
        ],
        out_specs=pl.BlockSpec((None, Co, TM), lambda p, t: (p, 0, t)),
        out_shape=jax.ShapeDtypeStruct((4, Co, Mq), jnp.float32),
        compiler_params=pltpu.CompilerParams(
            dimension_semantics=("parallel", "parallel")),
    )(y_conv, scale, shift, rnd)

    # ---- reassemble the 4 parity phases into NCHW ----
    y6 = y_act.reshape(2, 2, Co, N, Hq, Wq)                 # (ph, pw, co, n, oq, owq)
    y = jnp.transpose(y6, (3, 2, 4, 0, 5, 1)).reshape(N, Co, Hout, Wout)
    if skip_input is not None:
        y = jnp.concatenate([y, skip_input.astype(y.dtype)], axis=1)   # dim=1 (C)
    return y


# ---------------------------------------------------------------------------
# Pure-JAX reference (no dropout) for a correctness sanity check.
# ---------------------------------------------------------------------------
def _reference_no_dropout(x, w, b, gamma, beta, padding, eps):
    N, Ci, Hin, Win = x.shape
    _, Co, K, _ = w.shape
    Hd, Wd = (Hin - 1) * 2 + 1, (Win - 1) * 2 + 1
    xd = jnp.zeros((N, Ci, Hd, Wd), jnp.float32).at[:, :, ::2, ::2].set(x)
    P = K - 1 - padding
    xp = jnp.pad(xd, ((0, 0), (0, 0), (P, P), (P, P)))
    wf = jnp.transpose(w[:, :, ::-1, ::-1], (1, 0, 2, 3))   # (Co, Ci, K, K), flipped
    y = lax.conv_general_dilated(xp, wf, window_strides=(1, 1), padding='VALID',
                                 dimension_numbers=('NCHW', 'OIHW', 'NCHW'))
    y = y + b.reshape(1, Co, 1, 1)
    mean = jnp.mean(y, axis=(0, 2, 3), keepdims=True)
    var = jnp.mean((y - mean) ** 2, axis=(0, 2, 3), keepdims=True)
    y = (y - mean) * lax.rsqrt(var + eps)
    y = y * gamma.reshape(1, Co, 1, 1) + beta.reshape(1, Co, 1, 1)
    return jnp.maximum(y, 0.0)


if __name__ == "__main__":
    key = jax.random.PRNGKey(0)
    k_x, k_w, k_b, k_s = jax.random.split(key, 4)

    # Module config: in_channel=4, out_shape=8, filter_size=4, p_keep_drop=0.8,
    # padding=1 (stride=2 fixed by the module), batchnorm=True.
    N, Ci, Hin, Win = 2, 4, 8, 8
    Co, K, pad = 8, 4, 1
    Hout = (Hin - 1) * 2 - 2 * pad + K                      # = 16

    x = jax.random.normal(k_x, (N, Ci, Hin, Win), dtype=jnp.float32)
    w = jax.random.normal(k_w, (Ci, Co, K, K), dtype=jnp.float32) * 0.1
    b = jax.random.normal(k_b, (Co,), dtype=jnp.float32) * 0.1
    gamma = jnp.ones((Co,), dtype=jnp.float32)
    beta = jnp.zeros((Co,), dtype=jnp.float32)
    skip = jax.random.normal(k_s, (N, Ci, Hout, Hout), dtype=jnp.float32)

    # Deterministic check of the deconv+BN+ReLU path (dropout disabled).
    out_nd = g_deconv_bn_dr_relu_concat(x, w, b, gamma, beta, seed=0,
                                        skip_input=None, padding=pad,
                                        p_keep_drop=1.0)
    out_nd = jax.block_until_ready(out_nd)
    ref = _reference_no_dropout(x, w, b, gamma, beta, pad, 1e-5)
    err = float(jnp.max(jnp.abs(out_nd - ref)))
    assert err < 0.1, f"kernel deviates from reference: max abs err = {err}"

    # Full module forward (training-mode dropout + skip concat).
    out = g_deconv_bn_dr_relu_concat(x, w, b, gamma, beta, seed=1234,
                                     skip_input=skip, padding=pad,
                                     p_keep_drop=0.8)
    out = jax.block_until_ready(out)
    assert out.shape == (N, Co + Ci, Hout, Hout), out.shape
    print("KERNEL_OK")
</pallas_src>

<mosaic_0001>
module attributes {stable_mosaic.version = 11 : i64} {
  func.func @_conv_stats_kernel(%arg0: i32, %arg1: i32, %arg2: memref<1x16x128xbf16, #tpu.memory_space<vmem>>, %arg3: memref<1x8x16xbf16, #tpu.memory_space<vmem>>, %arg4: memref<8x1xf32, #tpu.memory_space<vmem>>, %arg5: memref<1x8x128xf32, #tpu.memory_space<vmem>>, %arg6: memref<1x1x8x2xf32, #tpu.memory_space<vmem>>) attributes {dimension_semantics = [#tpu.dimension_semantics<parallel>, #tpu.dimension_semantics<parallel>], iteration_bounds = array<i64: 4, 1>, scalar_prefetch = 0 : i64, scratch_operands = 0 : i64, tpu.core_type = #tpu.core_type<tc>, window_params = [{transform_indices = @transform_0, window_bounds = array<i64: 1, 16, 128>}, {transform_indices = @transform_1, window_bounds = array<i64: 1, 8, 16>}, {pipeline_mode = #tpu.pipeline_mode<synchronous>, transform_indices = @transform_2, window_bounds = array<i64: 8, 1>}, {transform_indices = @transform_3, window_bounds = array<i64: 1, 8, 128>}, {transform_indices = @transform_4, window_bounds = array<i64: 1, 1, 8, 2>}]} {
    %c0 = arith.constant 0 : index
    %c0_0 = arith.constant 0 : index
    %c0_1 = arith.constant 0 : index
    %0 = vector.load %arg3[%c0, %c0_0, %c0_1] : memref<1x8x16xbf16, #tpu.memory_space<vmem>>, vector<1x8x16xbf16>
    %1 = vector.shape_cast %0 : vector<1x8x16xbf16> to vector<8x16xbf16>
    %c0_2 = arith.constant 0 : index
    %c0_3 = arith.constant 0 : index
    %c0_4 = arith.constant 0 : index
    %2 = vector.load %arg2[%c0_2, %c0_3, %c0_4] : memref<1x16x128xbf16, #tpu.memory_space<vmem>>, vector<1x16x128xbf16>
    %3 = vector.shape_cast %2 : vector<1x16x128xbf16> to vector<16x128xbf16>
    %cst = arith.constant dense<0.000000e+00> : vector<8x128xf32>
    %4 = tpu.matmul %1, %3, %cst {dimension_numbers = #tpu.dot_dimension_numbers<[1], [0], [0], [1], [0, 0, 1, 1], [], []>} : vector<8x16xbf16>, vector<16x128xbf16>, vector<8x128xf32> -> vector<8x128xf32>
    %c0_5 = arith.constant 0 : index
    %c0_6 = arith.constant 0 : index
    %5 = vector.load %arg4[%c0_5, %c0_6] : memref<8x1xf32, #tpu.memory_space<vmem>>, vector<8x1xf32>
    %6 = vector.broadcast %5 : vector<8x1xf32> to vector<8x128xf32>
    %7 = arith.addf %4, %6 : vector<8x128xf32>
    %c0_7 = arith.constant 0 : index
    %c0_8 = arith.constant 0 : index
    %c0_9 = arith.constant 0 : index
    %8 = vector.load %arg5[%c0_7, %c0_8, %c0_9] : memref<1x8x128xf32, #tpu.memory_space<vmem>>, vector<1x8x128xf32>
    %9 = vector.shape_cast %8 : vector<1x8x128xf32> to vector<8x128xf32>
    %10 = vector.shape_cast %7 : vector<8x128xf32> to vector<1x8x128xf32>
    tpu.vector_store %arg5[%c0_7, %c0_8, %c0_9], %10 {strides = array<i32>} : memref<1x8x128xf32, #tpu.memory_space<vmem>>, vector<1x8x128xf32>,
    %cst_10 = arith.constant dense<0.000000e+00> : vector<8xf32>
    %11 = vector.multi_reduction <add>, %7, %cst_10 [1] : vector<8x128xf32> to vector<8xf32>
    %12 = vector.shape_cast %11 : vector<8xf32> to vector<8x1xf32>
    %13 = arith.mulf %7, %7 : vector<8x128xf32>
    %cst_11 = arith.constant dense<0.000000e+00> : vector<8xf32>
    %14 = vector.multi_reduction <add>, %13, %cst_11 [1] : vector<8x128xf32> to vector<8xf32>
    %15 = vector.shape_cast %14 : vector<8xf32> to vector<8x1xf32>
    %16 = tpu.concatenate %12, %15 in 1 : vector<8x1xf32>, vector<8x1xf32> -> vector<8x2xf32>
    %c0_12 = arith.constant 0 : index
    %c0_13 = arith.constant 0 : index
    %c0_14 = arith.constant 0 : index
    %c0_15 = arith.constant 0 : index
    %17 = vector.load %arg6[%c0_12, %c0_13, %c0_14, %c0_15] : memref<1x1x8x2xf32, #tpu.memory_space<vmem>>, vector<1x1x8x2xf32>
    %18 = vector.shape_cast %17 : vector<1x1x8x2xf32> to vector<8x2xf32>
    %19 = vector.shape_cast %16 : vector<8x2xf32> to vector<1x1x8x2xf32>
    tpu.vector_store %arg6[%c0_12, %c0_13, %c0_14, %c0_15], %19 {strides = array<i32>} : memref<1x1x8x2xf32, #tpu.memory_space<vmem>>, vector<1x1x8x2xf32>,
    return
  }
  func.func @transform_0(%arg0: i32, %arg1: i32) -> (i32, i32, i32) {
    %c0_i32 = arith.constant 0 : i32
    %c0_i32_0 = arith.constant 0 : i32
    return %arg0, %c0_i32, %arg1 : i32, i32, i32
  }
  func.func @transform_1(%arg0: i32, %arg1: i32) -> (i32, i32, i32) {
    %c0_i32 = arith.constant 0 : i32
    %c0_i32_0 = arith.constant 0 : i32
    %c0_i32_1 = arith.constant 0 : i32
    return %arg0, %c0_i32, %c0_i32_0 : i32, i32, i32
  }
  func.func @transform_2(%arg0: i32, %arg1: i32) -> (i32, i32) {
    %c0_i32 = arith.constant 0 : i32
    %c0_i32_0 = arith.constant 0 : i32
    %c0_i32_1 = arith.constant 0 : i32
    return %c0_i32, %c0_i32_0 : i32, i32
  }
  func.func @transform_3(%arg0: i32, %arg1: i32) -> (i32, i32, i32) {
    %c0_i32 = arith.constant 0 : i32
    %c0_i32_0 = arith.constant 0 : i32
    return %arg0, %c0_i32, %arg1 : i32, i32, i32
  }
  func.func @transform_4(%arg0: i32, %arg1: i32) -> (i32, i32, i32, i32) {
    %c0_i32 = arith.constant 0 : i32
    %c0_i32_0 = arith.constant 0 : i32
    %c0_i32_1 = arith.constant 0 : i32
    return %arg0, %arg1, %c0_i32, %c0_i32_0 : i32, i32, i32, i32
  }
}

</mosaic_0001>

<bundles_post_ra>
// kernel: tpu_custom_call.1
= control target key start
LH: loop header
LB: loop body
LE: loop exit
PB: predicated region body
PF: predicated region fallthrough
CT: control target
= control target key end

     0   :  { %10 = vsyncpa [#allocation3], 0  ;;  %s1018_s0 = inlined_call_operand.hbm [shape: bf16[4,16,128], index: 0, kind: input, shape index: {}]   ;;  %s1019_s1 = inlined_call_operand.hbm [shape: bf16[4,8,16], index: 1, kind: input, shape index: {}]   ;;  %s1020_s2 = inlined_call_operand.vmem [shape: f32[8,1], index: 2, kind: input, shape index: {}]   ;;  %s1021_s3 = inlined_call_operand.hbm [shape: f32[4,8,128], index: 3, kind: output, shape index: {0}]   ;;  %s1022_s4 = inlined_call_operand.vmem [shape: f32[4,1,8,2], index: 4, kind: output, shape index: {1}]  }
   0x1   :  { %12 = vsyncpa [#allocation3 + $0x1], 0 }
   0x2   :  { %13 = vsyncpa [#allocation6], 0 }
   0x3   :  { %15 = vsyncpa [#allocation6 + $0x1], 0 }
   0x4   :  { %16 = vsyncpa [#allocation4], 0 }
   0x5   :  { %18 = vsyncpa [#allocation4 + $0x1], 0  ;;  %s803_s15 = smov 0   ;;  %s805_s16 = smov 0  }
   0x6   :  { %s807_s17 = smov 0   ;;  %s809_s18 = smov 0  }
   0x7   :  { %s811_s19 = smov 0   ;;  %s813_s20 = smov 0  }
   0x8 LB: > { %s519_s21 = sadd.s32 4294967295, %s768_s20   ;;  %s520_s22 = sadd.s32 4294967294, %s768_s20   ;;  %s768_s20 = sphi %s813_s20, %s24_s20   ;;  %s764_s19 = sphi %s811_s19, %s1040_s19   ;;  %s760_s18 = sphi %s809_s18, %s1039_s18   ;;  %s756_s17 = sphi %s807_s17, %s1038_s17   ;;  %s752_s16 = sphi %s805_s16, %s1037_s16   ;;  %s748_s15 = sphi %s803_s15, %s1036_s15  }
   0x9   : > { %s36_s23 = sadd.s32 1, %s764_s19  ;;  %s45_s24 = sadd.s32 1, %s756_s17 }
   0xa   : > { %p38_p0 = scmp.ge.s32.totalorder %s36_s23, 4  ;;  %p52_p1 = scmp.ne.s32.totalorder %s756_s17, %s752_s16 }
   0xb   : > { %p53_p2 = scmp.eq.s32.totalorder %s768_s20, 0  ;;  %p58_p3 = scmp.ne.s32.totalorder %s752_s16, %s748_s15 }
   0xc   : > { %s1042_s23 = smov (%p38_p0, %s36_s23), 0  ;;  %p59_p5 = scmp.eq.s32.totalorder %s519_s21, 0 }
   0xd   : > { %p844_p4 = por %p53_p2, %p52_p1  ;;  %s40_s26 = ssub.s32 %s764_s19, %s1042_s23 }
   0xe   : > { %p131_p6 = scmp.eq.s32.totalorder %s519_s21, 3  ;;  %p43_p7 = scmp.eq.s32.totalorder %s40_s26, 0 }
   0xf   : > { %p850_p8 = por %p59_p5, %p58_p3  ;;  %p137_p10 = scmp.eq.s32.totalorder %s520_s22, 3 }
  0x10   : > { %p854_p9 = por %p131_p6, %p52_p1  ;;  %p565_p12 = scmp.lt.s32.totalorder %s768_s20, 4 }
  0x11   : > { %s1026_s27 = scalar_select %p850_p8, 1, 0 }
  0x12   : > { %s1027_s28 = scalar_select %p854_p9, 1, 0 }
  0x13   : > { %s859_s29 = scalar_select %p43_p7, %s756_s17, %s45_s24  }
  0x14   : > { %p861_p11 = por %p137_p10, %p58_p3  ;;  %s867_s5 = sand.u32 1, %s756_s17  }
  0x15   : > { %s523_s6 = sshll.u32 %s867_s5, 3  ;;  %s539_s7 = sshll.u32 %s764_s19, 7 }
  0x16   : > { %s1028_s30 = scalar_select %p861_p11, 1, 0 }
  0x17   : > { %s874_s10 = scalar_lea.hbm %s1018_s0, %s539_s7  ;;  %s192_s11 = scalar_lea.vmem [#allocation2], %s523_s6 }
  0x18   : > { %s200_s12 = sshll.u32 %s192_s11, 4  ;;  %p880_p13 = pnand %p565_p12, %p844_p4  ;;  %s876_s12 = int_to_ptr.vmem [resolvable:$true] %s200_s12 }
  0x19   : > { %s189_s14 = scalar_lea.sflag [#allocation3], %s867_s5  ;;  %s622_s21 = scalar_lea.hbm %s874_s10, 128 }
  0x1a   : > { %p623_p1 = scmp.ne.s32.totalorder %s874_s10, %s622_s21  ;;  %p624_p2 = pneg %p880_p13 }
  0x1b   : > { %s627_s25 = scalar_lea.hbm %s1018_s0, 512  ;;  %p628_p4 = scmp.lt.u32.totalorder %s874_s10, %s1018_s0 }
  0x1c   : > { %p625_p3 = pnand %p624_p2, %p623_p1  ;;  %p629_p6 = scmp.lt.u32.totalorder %s627_s25, %s622_s21 }
  0x1d   : > { %p631_p10 = scmp.lt.u32.totalorder %s622_s21, %s874_s10 }
  0x1e   : > { %p626_p5 = pneg %p625_p3  ;;  %p630_p7 = por %p629_p6, %p628_p4 }
  0x20   : > { %p632_p12 = por %p631_p10, %p630_p7 }
  0x22   : > { %p633_p0 = pnand %p632_p12, %p626_p5 }
  0x24   : > { %636 = shalt.err (!%p633_p0)
}
  0x25   : > { %s637_s7 = scalar_lea.vmem %s876_s12, 128  ;;  %s770_s8 = smov [#allocation2]  }
  0x26   : > { %p638_p1 = scmp.ne.s32.totalorder %s876_s12, %s637_s7  ;;  %s642_s9 = sshll.u32 %s770_s8, 4  ;;  %s643_s9 = int_to_ptr.vmem [resolvable:$false] %s642_s9 }
  0x27   : > { %s644_s11 = scalar_lea.vmem %s643_s9, 256  ;;  %p645_p9 = scmp.lt.s32.totalorder %s876_s12, %s643_s9 }
  0x28   : > { %p640_p3 = pnand %p638_p1, %p624_p2  ;;  %p646_p4 = scmp.lt.s32.totalorder %s644_s11, %s637_s7 }
  0x2a   : > { %p641_p11 = pneg %p640_p3  ;;  %p647_p6 = por %p646_p4, %p645_p9 }
  0x2c   : > { %p648_p7 = pnand %p647_p6, %p641_p11 }
  0x2e   : > { %651 = shalt.err (!%p648_p7)
}
  0x2f   : > { %s771_s21 = smov 64   ;;  %s772_s22 = smov 4  }
  0x30   : > { %557 = dma.hbm_to_vmem [thread:$0]  (!%p880_p13), %s874_s10, 128, %s876_s12, %s189_s14, %s771_s21, %s771_s21, %s772_s22  }
  0x31   : > { %p226_p0 = scmp.lt.s32.totalorder %s768_s20, 5  ;;  %s526_s24 = sshll.u32 %s867_s5, 2 }
  0x32   : > { %s527_s25 = sshll.u32 %s764_s19, 6  ;;  %p1030_p9 = scmp.ge.s32.totalorder %s768_s20, 1 }
  0x33   : > { %s925_s8 = scalar_lea.hbm %s1019_s1, %s527_s25  ;;  %s214_s9 = scalar_lea.vmem [#allocation5], %s526_s24 }
  0x34   : > { %p918_p11 = pnand %p1030_p9, %p226_p0  ;;  %s221_s11 = sshll.u32 %s214_s9, 4  ;;  %s222_s11 = int_to_ptr.vmem [resolvable:$true] %s221_s11 }
  0x35   : > { %s211_s10 = scalar_lea.sflag [#allocation6], %s867_s5  ;;  %s652_s12 = scalar_lea.hbm %s925_s8, 64 }
  0x36   : > { %s1031_s26 = scalar_select %p918_p11, 1, 0 }
  0x37   : > { %p653_p5 = scmp.ne.s32.totalorder %s925_s8, %s652_s12  ;;  %s657_s22 = scalar_lea.hbm %s1019_s1, 256 }
  0x38   : > { %p658_p1 = scmp.lt.u32.totalorder %s925_s8, %s1019_s1  ;;  %p659_p3 = scmp.lt.u32.totalorder %s657_s22, %s652_s12 }
  0x39   : > { %p655_p10 = pnand %p653_p5, %p624_p2  ;;  %p661_p6 = scmp.lt.u32.totalorder %s652_s12, %s925_s8 }
  0x3a   : > { %p660_p4 = por %p659_p3, %p658_p1 }
  0x3b   : > { %p656_p12 = pneg %p655_p10 }
  0x3c   : > { %p662_p7 = por %p661_p6, %p660_p4 }
  0x3e   : > { %p663_p0 = pnand %p662_p7, %p656_p12 }
  0x40   : > { %666 = shalt.err (!%p663_p0)
}
  0x41   : > { %s667_s5 = scalar_lea.vmem %s222_s11, 64  ;;  %s773_s24 = smov [#allocation5]  }
  0x42   : > { %p668_p9 = scmp.ne.s32.totalorder %s222_s11, %s667_s5  ;;  %s672_s7 = sshll.u32 %s773_s24, 4  ;;  %s673_s7 = int_to_ptr.vmem [resolvable:$false] %s672_s7 }
  0x43   : > { %s674_s9 = scalar_lea.vmem %s673_s7, 128  ;;  %p675_p8 = scmp.lt.s32.totalorder %s222_s11, %s673_s7 }
  0x44   : > { %p670_p5 = pnand %p668_p9, %p624_p2  ;;  %p676_p11 = scmp.lt.s32.totalorder %s674_s9, %s667_s5 }
  0x46   : > { %p671_p10 = pneg %p670_p5  ;;  %p677_p1 = por %p676_p11, %p675_p8 }
  0x48   : > { %p678_p3 = pnand %p677_p1, %p671_p10 }
  0x4a   : > { %681 = shalt.err (!%p678_p3)
}
  0x4b   : > { %560 = dma.hbm_to_vmem [thread:$0]  (!%p880_p13), %s925_s8, 64, %s222_s11, %s211_s10  }
  0x4c   : > { %p1032_p12 = scmp.ne.s32.totalorder %s1031_s26, 0 }
  0x4d   : > { %s950_s12 = sand.u32 (!%p1032_p12), 1, %s752_s16   ;;  %p1033_p2 = scmp.ne.s32.totalorder (!%p1032_p12), %s1026_s27, 0 }
  0x4e   : > { %230 = sbr.rel (%p1032_p12) target bundleno = 454 (0x1c6), region = 32  ;;  %s529_s14 = sshll.u32 (!%p1032_p12), %s950_s12, 3 }
  0x4f   : > { %s233_s21 = scalar_lea.sflag (!%p1032_p12), [#allocation3], %s950_s12  ;;  %s236_s22 = scalar_lea.vmem (!%p1032_p12), [#allocation2], %s529_s14 }
  0x55   : > { %735 = dma.done.wait (%p1033_p2), %s233_s21, 128  }
  0x56   : > { %737 = vsyncadd (%p1033_p2), %s233_s21, 4294967168  ;;  %s530_s13 = sshll.u32 %s950_s12, 2  ;;  %s242_s26 = scalar_lea.sflag [#allocation6], %s950_s12 }
  0x57   : > { %s245_s8 = scalar_lea.vmem [#allocation5], %s530_s13 }
  0x58   : > { %739 = dma.done.wait (%p1033_p2), %s242_s26, 64  }
  0x59   : > { %741 = vsyncadd (%p1033_p2), %s242_s26, 4294967232  ;;  %v774_v0 = vmov 0.0   ;;  %vm775_vm0 = vmmov 0   ;;  %v776_v1 = vmov 0   ;;  %v621_v2 = vld [vmem:[%s236_s22] sm:$0xff]   ;;  %vm305_vm1 = vcmask 130048  }
  0x5a   : > { %542 = vmatprep.subr.bf16.mxu0 %v774_v0  ;;  %544 = vmatprep.mubr.msk.bf16.mxu0 %vm775_vm0, %v774_v0  ;;  %v293_v3 = vld [vmem:[%s1020_s2] sm:$0xff]  ;;  %v290_v4 = vld [vmem:[%s245_s8] sm:$0xf]  ;;  %s272_s27 = scalar_lea.vmem [#allocation7], %s529_s14  ;;  %s536_s25 = sshll.u32 %s760_s18, 7 }
  0x5b   : > { %620 = vset.pattern.permute.xlu0 %v776_v1  ;;  %543 = vmatpush3.bf16.msra.mxu0 %v621_v2  ;;  %s971_s24 = scalar_lea.hbm %s1021_s3, %s536_s25  ;;  %s381_s7 = sshll.u32 %s272_s27, 4  ;;  %s382_s7 = int_to_ptr.vmem [resolvable:$true] %s381_s7 }
  0x5c   : > { %296 = vperm.xlu0 %620, %v293_v3   ;;  %s360_s9 = scalar_lea.sflag [#allocation4], %s950_s12  ;;  %s682_s21 = scalar_lea.vmem %s382_s7, 128 }
  0x5d   : > { %p683_p8 = scmp.ne.s32.totalorder %s382_s7, %s682_s21  ;;  %p1034_p13 = scmp.ne.s32.totalorder %s1027_s28, 0 }
  0x5e   : > { %545 = vmatmul.mubr.msk.bf16.vlgmr.msra.gmra.mrb[0].mxu0 %vm305_vm1, %v290_v4  ;;  %s777_s14 = smov [#allocation7]  }
  0x5f   : > { %p684_p11 = pnand %p683_p8, %p1034_p13  ;;  %s686_s22 = sshll.u32 %s777_s14, 4  ;;  %s687_s22 = int_to_ptr.vmem [resolvable:$false] %s686_s22 }
  0x60   : > { %s688_s13 = scalar_lea.vmem %s687_s22, 256  ;;  %p689_p6 = scmp.lt.s32.totalorder %s382_s7, %s687_s22 }
  0x61   : > { %p685_p4 = pneg %p684_p11  ;;  %p690_p7 = scmp.lt.s32.totalorder %s688_s13, %s682_s21 }
  0x63   : > { %p691_p0 = por %p690_p7, %p689_p6 }
  0x65   : > { %p692_p9 = pnand %p691_p0, %p685_p4 }
  0xdb   : > { %v297_v5 = vpop.permute.xlu0 %296 }
 0x131   : > { %v343_v6 = vpop.f32.mrb[0].mxu0 }
 0x132   : > { %v344_v7 = vadd.f32 %v343_v6, %v297_v5  ;;  %v546_v8 = vpop.f32.mrb[1].mxu0 }
 0x133   : > { %v346_v9 = vpop.f32.mrb[2].mxu0 }
 0x134   : > { %349 = vst [vmem:[%s272_s27] sm:$0xff] %v344_v7  ;;  %350 = vadd.xlane.f32.xlu0 %v344_v7  ;;  %v547_v10 = vpop.f32.mrb[3].mxu0  ;;  %v352_v11 = vmul.f32 %v344_v7, %v344_v7 }
 0x136   : > { %353 = vadd.xlane.f32.xlu1 %v352_v11 }
 0x137   : > { %695 = shalt.err (!%p692_p9)
}
 0x138   : > { %s696_s12 = scalar_lea.hbm %s971_s24, 128  ;;  %s700_s11 = scalar_lea.hbm %s1021_s3, 512 }
 0x139   : > { %p697_p5 = scmp.ne.s32.totalorder %s971_s24, %s696_s12  ;;  %p701_p3 = scmp.lt.u32.totalorder %s971_s24, %s1021_s3 }
 0x13a   : > { %p702_p12 = scmp.lt.u32.totalorder %s700_s11, %s696_s12  ;;  %p704_p8 = scmp.lt.u32.totalorder %s696_s12, %s971_s24 }
 0x13b   : > { %p698_p10 = pnand %p697_p5, %p1034_p13 }
 0x13c   : > { %p703_p2 = por %p702_p12, %p701_p3 }
 0x13d   : > { %p699_p1 = pneg %p698_p10 }
 0x13e   : > { %p705_p11 = por %p704_p8, %p703_p2 }
 0x140   : > { %p706_p4 = pnand %p705_p11, %p699_p1 }
 0x142   : > { %709 = shalt.err (!%p706_p4)
}
 0x143   : > { %552 = dma.vmem_to_hbm [thread:$0]  (%p1034_p13), %s382_s7, 128, %s971_s24, %s360_s9   ;;  %vm355_vm2 = vcmask 7168   ;;  %vm357_vm3 = vcmask 15360  }
 0x144   : > { %p282_p6 = scmp.lt.s32.totalorder %s760_s18, 3 }
 0x146   : > { %s1044_s18 = smov (!%p282_p6, %s760_s18), 3 }
 0x147   : > { %s532_s25 = sshll.u32 %s1044_s18, 3 }
 0x148   : > { %s288_s21 = scalar_lea.vmem %s1022_s4, %s532_s25 }
 0x1c1   : > { %v351_v12 = vpop.xlane.xlu0 %350 }
 0x1c3   : > { %v354_v13 = vpop.xlane.xlu1 %353 }
 0x1c4   : > { %v356_v14 = vsel %vm355_vm2, %v351_v12, %v354_v13 }
 0x1c5   : > { %358 = vst.msk [vmem:[%s288_s21] sm:$0xff] %vm357_vm3, %v356_v14 }
 0x1c6 PF: > { %p566_p7 = scmp.ge.s32.totalorder %s768_s20, 2  ;;  %s396_s28 = sand.u32 1, %s748_s15  }
 0x1c7   : > { %p1035_p13 = scmp.ne.s32.totalorder %s1028_s30, 0  ;;  %s397_s24 = scalar_lea.sflag [#allocation4], %s396_s28 }
 0x1c9   : > { %p562_p0 = pnand %p566_p7, %p1035_p13 }
 0x1cb   : > { %743 = dma.done.wait (!%p562_p0), %s397_s24, 128  }
 0x1cc   : > { %745 = vsyncadd (!%p562_p0), %s397_s24, 4294967168  ;;  %s24_s20 = sadd.s32 1, %s768_s20   ;;  %s1036_s15 = smov %s752_s16 }
 0x1cd   : > { %p21_p9 = scmp.ge.s32.totalorder %s24_s20, 6   ;;  %s1037_s16 = smov %s756_s17 }
 0x1ce   : > { %s1038_s17 = smov %s859_s29  ;;  %s1039_s18 = smov %s764_s19 }
 0x1cf   : > { %s1040_s19 = smov %s1042_s23  ;;  %23 = sbr.rel (!%p21_p9) target bundleno = 8 (0x8), region = 102 }
 0x1d6   :  { %412 = vsyncpa [#allocation3], 1 }
 0x1d7   :  { %414 = vsyncpa [#allocation3 + $0x1], 1 }
 0x1d8   :  { %415 = vsyncpa [#allocation6], 1 }
 0x1d9   :  { %417 = vsyncpa [#allocation6 + $0x1], 1 }
 0x1da   :  { %418 = vsyncpa [#allocation4], 1 }
 0x1db   :  { %420 = vsyncpa [#allocation4 + $0x1], 1 }

</bundles_post_ra>
